<compile_context>
chip_gen: v7x
topology: tpu7x:2x2x1
jax: 0.10.0
libtpu: 0.0.40
codegen_flags: <defaults>
</compile_context>

<pallas_src>
import functools

import jax
import jax.numpy as jnp
from jax.experimental import pallas as pl
from jax.experimental.pallas import tpu as pltpu


def _ceil_to(x, m):
    return ((x + m - 1) // m) * m


def _vmem_limit_bytes(estimate_bytes):
    """Explicit scoped-VMEM request, capped at ~90% of the chip's physical VMEM."""
    try:
        cap = int(getattr(pltpu.get_tpu_info(), "vmem_capacity_bytes", 64 << 20))
    except Exception:
        cap = 64 << 20
    return int(min(max(int(estimate_bytes), 32 << 20), int(cap * 0.9)))


# ----------------------------------------------------------------------------
# pltpu.roll direction probe (runs one trivial kernel, once, outside jit)
# ----------------------------------------------------------------------------
@functools.lru_cache(maxsize=None)
def _roll_is_jnp_like():
    """True iff pltpu.roll(x, s, axis) == jnp.roll(x, s, axis) (shift toward higher idx)."""
    def k(x_ref, o_ref):
        o_ref[...] = pltpu.roll(x_ref[...], 1, 1)

    x = jnp.arange(8 * 256, dtype=jnp.int32).reshape(8, 256)
    y = pl.pallas_call(k, out_shape=jax.ShapeDtypeStruct((8, 256), jnp.int32))(x)
    return bool(jnp.array_equal(y, jnp.roll(x, 1, axis=1)))


# ----------------------------------------------------------------------------
# Pallas kernels
# ----------------------------------------------------------------------------
def _make_fused_double_conv_kernel(shifts, cip, co1p, co2):
    """conv1 -> conv2 on one resident PF image; each conv = one stacked MXU dot."""

    def kernel(f_ref, w1_ref, b1_ref, w2_ref, b2_ref, m_ref,
               y2_ref, sum_ref, sq_ref,
               stage1_ref, y1_ref, stage2_ref):
        # f_ref:  (Cip,  Lpad) bf16      w1_ref: (Co1p, 9*Cip)  bf16   b1_ref: (Co1p,1) f32
        # w2_ref: (Co2, 9*Co1p) bf16     b2_ref: (Co2,1) f32
        # m_ref:  (1, Lpad) f32 (1.0 at valid pixels, else 0.0)
        # y2_ref: (Co2, Lpad) bf16       sum_ref / sq_ref: (Co2,1) f32 BN partials
        # stage1_ref: VMEM (9*Cip, Lpad) bf16   y1_ref: VMEM (Co1p, Lpad) bf16
        # stage2_ref: VMEM (9*Co1p, Lpad) bf16
        mask = m_ref[...]
        f = f_ref[...]

        # ---- conv1: stage 9 rolled taps, single (Co1p, 9*Cip)@(9*Cip, Lpad) dot ----
        for t, s in enumerate(shifts):
            tap = f if s == 0 else pltpu.roll(f, s, 1)        # XLU lane rotate, cheap
            stage1_ref[t * cip:(t + 1) * cip, :] = tap
        acc1 = jnp.dot(w1_ref[...], stage1_ref[...],
                       preferred_element_type=jnp.float32)
        y1 = (acc1 + b1_ref[...]) * mask                       # re-zero pad ring
        y1_ref[...] = y1.astype(jnp.bfloat16)                  # stays in VMEM only

        # ---- conv2 straight off the VMEM-resident intermediate ---------------------
        g = y1_ref[...]
        for t, s in enumerate(shifts):
            tap = g if s == 0 else pltpu.roll(g, s, 1)
            stage2_ref[t * co1p:(t + 1) * co1p, :] = tap
        acc2 = jnp.dot(w2_ref[...], stage2_ref[...],
                       preferred_element_type=jnp.float32)
        y2 = (acc2 + b2_ref[...]) * mask
        y2_ref[...] = y2.astype(y2_ref.dtype)                  # bf16 HBM writeback

        # BN batch-statistic partials from the f32 value (pads contribute exactly 0)
        sum_ref[...] = jnp.sum(y2, axis=1, keepdims=True)
        sq_ref[...] = jnp.sum(y2 * y2, axis=1, keepdims=True)

    return kernel


def _make_bn_act_crop_kernel(act, hu, wu, cc):
    """Folded-BN affine + optional act, with the PF -> dense crop fused into the store."""
    def kernel(y_ref, scale_ref, shift_ref, o_ref):
        y = y_ref[...].astype(jnp.float32)                     # (Co, Lpad)
        out = y * scale_ref[...] + shift_ref[...]              # (Co,1) lane broadcast
        if act is not None:
            out = getattr(jax.nn, act)(out)
        # drop pad ring + lane tail: write dense (Co, Hu*Wu) row by row
        for r in range(hu):
            src = (r + 1) * cc + 1
            o_ref[:, r * wu:(r + 1) * wu] = out[:, src:src + wu]
    return kernel


# ----------------------------------------------------------------------------
# Pallas-backed ops
# ----------------------------------------------------------------------------
def fused_double_conv_pf(pf, w1s, b1, w2s, b2, mask, *,
                         lpad, cip, co1p, co2, cc, roll_jnp):
    """conv1+conv2 (3x3, same-pad) in PF layout. Returns (y2_bf16, sum, sumsq)."""
    n = pf.shape[0]
    offsets = tuple((dy - 1) * cc + (dx - 1) for dy in range(3) for dx in range(3))
    sign = 1 if roll_jnp else -1
    shifts = tuple(((-off) * sign) % lpad for off in offsets)
    kernel = _make_fused_double_conv_kernel(shifts, cip, co1p, co2)

    est = (2 * cip * lpad * 2                                   # input PF (double-buffered)
           + 2 * (co1p * 9 * cip + co2 * 9 * co1p) * 2          # weights
           + 2 * lpad * 4                                       # mask
           + 2 * co2 * lpad * 2                                 # y2 out
           + (9 * cip + co1p + 9 * co1p) * lpad * 2             # VMEM scratch
           + (co1p + co2) * lpad * 4)                           # f32 accumulators

    return pl.pallas_call(
        kernel,
        out_shape=(jax.ShapeDtypeStruct((n, co2, lpad), jnp.bfloat16),
                   jax.ShapeDtypeStruct((n, co2, 1), jnp.float32),
                   jax.ShapeDtypeStruct((n, co2, 1), jnp.float32)),
        grid_spec=pltpu.PrefetchScalarGridSpec(
            num_scalar_prefetch=0,
            grid=(n,),                                          # one image per step
            in_specs=[
                pl.BlockSpec((None, cip, lpad), lambda b: (b, 0, 0)),
                pl.BlockSpec((co1p, 9 * cip), lambda b: (0, 0)),
                pl.BlockSpec((co1p, 1), lambda b: (0, 0)),
                pl.BlockSpec((co2, 9 * co1p), lambda b: (0, 0)),
                pl.BlockSpec((co2, 1), lambda b: (0, 0)),
                pl.BlockSpec((1, lpad), lambda b: (0, 0)),
            ],
            out_specs=(
                pl.BlockSpec((None, co2, lpad), lambda b: (b, 0, 0)),
                pl.BlockSpec((None, co2, 1), lambda b: (b, 0, 0)),
                pl.BlockSpec((None, co2, 1), lambda b: (b, 0, 0)),
            ),
            scratch_shapes=[
                pltpu.VMEM((9 * cip, lpad), jnp.bfloat16),
                pltpu.VMEM((co1p, lpad), jnp.bfloat16),
                pltpu.VMEM((9 * co1p, lpad), jnp.bfloat16),
            ],
        ),
        compiler_params=pltpu.CompilerParams(
            dimension_semantics=("parallel",),
            vmem_limit_bytes=_vmem_limit_bytes(est)),
    )(pf, w1s, b1, w2s, b2, mask)


def bn_act_crop_pf(y_pf, scale_col, shift_col, act, *, hu, wu, cc):
    """Per-channel affine (folded BN) + optional act + PF->dense crop, tiled over batch."""
    n, co, lpad = y_pf.shape
    est = (2 * co * lpad * 2 + 2 * co * hu * wu * 4 + co * lpad * 4)
    return pl.pallas_call(
        _make_bn_act_crop_kernel(act, hu, wu, cc),
        out_shape=jax.ShapeDtypeStruct((n, co, hu * wu), jnp.float32),
        grid_spec=pltpu.PrefetchScalarGridSpec(
            num_scalar_prefetch=0,
            grid=(n,),
            in_specs=[
                pl.BlockSpec((None, co, lpad), lambda b: (b, 0, 0)),
                pl.BlockSpec((co, 1), lambda b: (0, 0)),
                pl.BlockSpec((co, 1), lambda b: (0, 0)),
            ],
            out_specs=pl.BlockSpec((None, co, hu * wu), lambda b: (b, 0, 0)),
        ),
        compiler_params=pltpu.CompilerParams(
            dimension_semantics=("parallel",),
            vmem_limit_bytes=_vmem_limit_bytes(est)),
    )(y_pf, scale_col, shift_col)


# ----------------------------------------------------------------------------
# Glue (plain JAX): bilinear upsample, PF packing, weight packing
# ----------------------------------------------------------------------------
def bilinear_upsample_2x(x_nchw):
    """PyTorch nn.Upsample(scale_factor=2, mode='bilinear', align_corners=False)."""
    N, C, H, W = x_nchw.shape

    def idx_weights(in_size):
        out = 2 * in_size
        j = jnp.arange(out, dtype=jnp.float32)
        s = jnp.maximum((j + 0.5) * 0.5 - 0.5, 0.0)             # PyTorch clamps negatives
        i0 = jnp.floor(s).astype(jnp.int32)
        i1 = jnp.minimum(i0 + 1, in_size - 1)
        w1 = s - i0.astype(jnp.float32)
        return i0, i1, 1.0 - w1, w1

    i0, i1, w0, w1 = idx_weights(H)
    xh = (x_nchw[:, :, i0, :] * w0[None, None, :, None]
          + x_nchw[:, :, i1, :] * w1[None, None, :, None])
    j0, j1, v0, v1 = idx_weights(W)
    xw = xh[:, :, :, j0] * v0 + xh[:, :, :, j1] * v1
    return xw


def _to_pf(x_nchw, lpad, cip):
    """(N,C,H,W) -> PF (N, Cip, Lpad): pad channels to Cip, zero-pad H/W by 1,
    flatten row-major, pad the flat axis up to Lpad (multiple of 128)."""
    n, c, h, w = x_nchw.shape
    xp = jnp.pad(x_nchw.astype(jnp.bfloat16),
                 ((0, 0), (0, cip - c), (1, 1), (1, 1)))
    pf = xp.reshape(n, cip, (h + 2) * (w + 2))
    return jnp.pad(pf, ((0, 0), (0, 0), (0, lpad - pf.shape[-1])))


def _pack_w_stacked(w_oihw, ci_pad, co_pad):
    """(Co,Ci,3,3) -> (Co_pad, 9*Ci_pad) bf16; tap t=3*dy+dx major, ci minor."""
    co, ci, kh, kw = w_oihw.shape
    w = jnp.transpose(w_oihw, (0, 2, 3, 1))                     # (Co, 3, 3, Ci)
    w = jnp.pad(w, ((0, co_pad - co), (0, 0), (0, 0), (0, ci_pad - ci)))
    return w.reshape(co_pad, kh * kw * ci_pad).astype(jnp.bfloat16)


# ----------------------------------------------------------------------------
# UpBlock forward
# ----------------------------------------------------------------------------
def up_block_forward(x_in, x_up, params, act=None):
    return _up_block_jit(x_in, x_up, params, act, _roll_is_jnp_like())


@functools.partial(jax.jit, static_argnames=("act", "roll_jnp"))
def _up_block_jit(x_in, x_up, params, act, roll_jnp):
    # concat + bilinear 2x upsample (XLA gather; inputs pre-cast to bf16 so the fused
    # gather/pad chain moves half the bytes).
    x = jnp.concatenate([x_in, x_up], axis=1).astype(jnp.bfloat16)   # (N, Cin, H, W)
    x = bilinear_upsample_2x(x)                                       # (N, Cin, Hu, Wu)
    n, ci, hu, wu = x.shape
    cc = wu + 2
    lp = (hu + 2) * cc
    lpad = _ceil_to(lp, 128)                                          # lane-dense flat width

    cip = _ceil_to(ci, 16)            # bf16 sublane-packing quantum
    co1 = params["w1"].shape[0]
    co1p = _ceil_to(co1, 16)
    co2 = params["w2"].shape[0]

    pf = _to_pf(x, lpad, cip)                                         # bf16 PF activations

    # valid-pixel mask over the PF flat axis (zeroes pad ring + lane tail)
    q = jnp.arange(lpad)
    rr, ccol = q // cc, q % cc
    mask = ((rr >= 1) & (rr <= hu) & (ccol >= 1) & (ccol <= wu)) \
        .astype(jnp.float32).reshape(1, lpad)

    w1s = _pack_w_stacked(params["w1"], cip, co1p)
    w2s = _pack_w_stacked(params["w2"], co1p, co2)
    b1 = jnp.pad(params["b1"], (0, co1p - co1)).reshape(-1, 1).astype(jnp.float32)
    b2 = params["b2"].reshape(-1, 1).astype(jnp.float32)

    # fused conv1 -> conv2: y2 in bf16 PF layout + per-image BN partial sums (from f32)
    y2, s1, s2 = fused_double_conv_pf(pf, w1s, b1, w2s, b2, mask,
                                      lpad=lpad, cip=cip, co1p=co1p, co2=co2,
                                      cc=cc, roll_jnp=roll_jnp)

    # tiny cross-image reduction + fold BN affine into (scale, shift)
    cnt = n * hu * wu
    ssum = jnp.sum(s1[:, :, 0], axis=0)
    sqsum = jnp.sum(s2[:, :, 0], axis=0)
    mean = ssum / cnt
    # NOTE: single-pass E[x^2]-E[x]^2 in f32; adequate for roughly zero-mean activations.
    var = jnp.maximum(sqsum / cnt - mean * mean, 0.0)                 # biased var (BN training)
    inv = jax.lax.rsqrt(var + 1e-5)
    scale = (params["gamma"] * inv).astype(jnp.float32)
    shift = (params["beta"] - mean * scale).astype(jnp.float32)

    # BN apply + optional act + PF->dense crop fused in one Pallas pass
    yflat = bn_act_crop_pf(y2, scale.reshape(-1, 1), shift.reshape(-1, 1), act,
                           hu=hu, wu=wu, cc=cc)
    return yflat.reshape(n, co2, hu, wu)                              # free reshape


# ----------------------------------------------------------------------------
# Params + pure-JAX reference (for the in-script correctness check)
# ----------------------------------------------------------------------------
def init_params(key, in_channels, out_channels, kernel_size=3):
    k1, k2, k3, k4, k5, k6 = jax.random.split(key, 6)
    fan1 = in_channels * kernel_size * kernel_size
    fan2 = out_channels * kernel_size * kernel_size
    return {
        "w1": jax.random.normal(
            k1, (out_channels, in_channels, kernel_size, kernel_size),
            jnp.float32) * (1.0 / jnp.sqrt(fan1)),
        "b1": jax.random.normal(k2, (out_channels,), jnp.float32) * 0.05,
        "w2": jax.random.normal(
            k3, (out_channels, out_channels, kernel_size, kernel_size),
            jnp.float32) * (1.0 / jnp.sqrt(fan2)),
        "b2": jax.random.normal(k4, (out_channels,), jnp.float32) * 0.05,
        "gamma": 1.0 + 0.1 * jax.random.normal(k5, (out_channels,), jnp.float32),
        "beta": 0.1 * jax.random.normal(k6, (out_channels,), jnp.float32),
    }


def _reference_forward(x_in, x_up, params, act=None):
    x = jnp.concatenate([x_in, x_up], axis=1)
    x = bilinear_upsample_2x(x)

    def conv(v, w, b):
        y = jax.lax.conv_general_dilated(
            v, w, window_strides=(1, 1), padding=((1, 1), (1, 1)),
            dimension_numbers=("NCHW", "OIHW", "NCHW"),
            precision=jax.lax.Precision.HIGHEST)
        return y + b[None, :, None, None]

    y = conv(x, params["w1"], params["b1"])
    y = conv(y, params["w2"], params["b2"])
    mean = jnp.mean(y, axis=(0, 2, 3), keepdims=True)
    var = jnp.mean(jnp.square(y - mean), axis=(0, 2, 3), keepdims=True)
    y = (y - mean) * jax.lax.rsqrt(var + 1e-5)
    y = y * params["gamma"][None, :, None, None] + params["beta"][None, :, None, None]
    if act is not None:
        y = getattr(jax.nn, act)(y)
    return y


if __name__ == "__main__":
    key = jax.random.PRNGKey(0)
    kx, ku, kp = jax.random.split(key, 3)

    N, C_half, H, W = 2, 4, 16, 16
    in_channels = 2 * C_half          # channels after concat
    out_channels = 8

    x_in = jax.random.normal(kx, (N, C_half, H, W), jnp.float32)
    x_up = jax.random.normal(ku, (N, C_half, H, W), jnp.float32)
    params = init_params(kp, in_channels, out_channels)

    y = up_block_forward(x_in, x_up, params, act=None)   # act=None matches module default
    jax.block_until_ready(y)

    assert y.shape == (N, out_channels, 2 * H, 2 * W), y.shape
    assert bool(jnp.all(jnp.isfinite(y)))

    # pure-JAX f32 reference; loose tolerance accounts for the bf16 MXU/storage path
    y_ref = _reference_forward(x_in, x_up, params, act=None)
    err = float(jnp.max(jnp.abs(y - y_ref)))
    assert err < 0.2, f"max abs error vs reference: {err}"

    print("KERNEL_OK")
</pallas_src>

<mosaic_0001>
module attributes {stable_mosaic.version = 11 : i64} {
  func.func @k(%arg0: memref<8x256xi32, #tpu.memory_space<vmem>>, %arg1: memref<8x256xi32, #tpu.memory_space<vmem>>) attributes {dimension_semantics = [], scalar_prefetch = 0 : i64, scratch_operands = 0 : i64, tpu.core_type = #tpu.core_type<tc>} {
    %c0 = arith.constant 0 : index
    %c0_0 = arith.constant 0 : index
    %0 = vector.load %arg0[%c0, %c0_0] : memref<8x256xi32, #tpu.memory_space<vmem>>, vector<8x256xi32>
    %c1_i32 = arith.constant 1 : i32
    %1 = tpu.dynamic_rotate %0 by %c1_i32 dim 1 : vector<8x256xi32>, i32 -> vector<8x256xi32>
    %c0_1 = arith.constant 0 : index
    %c0_2 = arith.constant 0 : index
    %2 = vector.load %arg1[%c0_1, %c0_2] : memref<8x256xi32, #tpu.memory_space<vmem>>, vector<8x256xi32>
    tpu.vector_store %arg1[%c0_1, %c0_2], %1 {strides = array<i32>} : memref<8x256xi32, #tpu.memory_space<vmem>>, vector<8x256xi32>,
    return
  }
}

</mosaic_0001>

<bundles_post_ra>
// kernel: tpu_custom_call.1
= control target key start
LH: loop header
LB: loop body
LE: loop exit
PB: predicated region body
PF: predicated region fallthrough
CT: control target
= control target key end

     0   :  { %6 = vsyncpa [#allocation3], 0  ;;  %s137_s0 = inlined_call_operand.hbm [shape: s32[8,256], index: 0, kind: input, shape index: {}]   ;;  %s138_s1 = inlined_call_operand.hbm [shape: s32[8,256], index: 1, kind: output, shape index: {}]  }
   0x1   :  { %7 = vsyncpa [#allocation4], 0  ;;  %s100_s6 = smov [#allocation2]   ;;  %s52_s10 = scalar_lea.hbm %s137_s0, 256 }
   0x2   :  { %s14_s7 = sshll.u32 %s100_s6, 4  ;;  %p53_p0 = scmp.ne.s32.totalorder %s137_s0, %s52_s10  ;;  %s15_s7 = int_to_ptr.vmem [resolvable:$true] %s14_s7 }
   0x3   :  { %p56_p1 = scmp.lt.u32.totalorder %s52_s10, %s137_s0 }
   0x5   :  { %p58_p2 = pnand %p56_p1, %p53_p0 }
   0x7   :  { %61 = shalt.err (!%p58_p2)
}
   0x8   :  { %s62_s15 = scalar_lea.vmem %s15_s7, 256  ;;  %p67_p4 = scmp.lt.s32.totalorder %s15_s7, %s15_s7 }
   0x9   :  { %p63_p3 = scmp.ne.s32.totalorder %s15_s7, %s62_s15  ;;  %p68_p5 = scmp.lt.s32.totalorder %s62_s15, %s62_s15 }
   0xb   :  { %p69_p6 = por %p68_p5, %p67_p4 }
   0xd   :  { %p70_p7 = pnand %p69_p6, %p63_p3 }
   0xf   :  { %73 = shalt.err (!%p70_p7)
}
  0x10   :  { %17 = dma.hbm_to_vmem [thread:$0]  %s137_s0, 256, %s15_s7, [#allocation3]  }
  0x11   :  { %96 = dma.done.wait [#allocation3], 256  }
  0x12   :  { %97 = vsyncadd [#allocation3], 4294967040  ;;  %v21_v0 = vld [vmem:[#allocation2] sm:$0xff]  ;;  %s101_s18 = smov 1   ;;  %v22_v1 = vld [vmem:[#allocation2 + $0x8] sm:$0xff]  ;;  %v27_v2 = vlaneseq  ;;  %s102_s19 = smov [#allocation5]  }
  0x13   :  { %23 = vrot.lane.b32.xlu0 %v21_v0, %s101_s18  ;;  %s40_s20 = sshll.u32 %s102_s19, 4  ;;  %s41_s20 = int_to_ptr.vmem [resolvable:$true] %s40_s20 }
  0x14   :  { %v28_v3 = vand.u32 127, %v27_v2  ;;  %s74_s0 = scalar_lea.vmem %s41_s20, 256  ;;  %p79_p9 = scmp.lt.s32.totalorder %s41_s20, %s41_s20 }
  0x15   :  { %p75_p8 = scmp.ne.s32.totalorder %s41_s20, %s74_s0  ;;  %p80_p10 = scmp.lt.s32.totalorder %s74_s0, %s74_s0 }
  0x16   :  { %vm29_vm0 = vcmp.lt.s32.totalorder %v28_v3, 1 }
  0x17   :  { %25 = vrot.lane.b32.xlu0 %v22_v1, %s101_s18  ;;  %p81_p11 = por %p80_p10, %p79_p9 }
  0x19   :  { %p82_p12 = pnand %p81_p11, %p75_p8 }
  0x85   :  { %v24_v4 = vpop.permute.xlu0 %23 }
  0x89   :  { %v26_v5 = vpop.permute.xlu0 %25 }
  0x8a   :  { %v30_v6 = vsel %vm29_vm0, %v24_v4, %v26_v5  ;;  %v31_v7 = vsel %vm29_vm0, %v26_v5, %v24_v4 }
  0x8b   :  { %32 = vst [vmem:[#allocation5] sm:$0xff] %v31_v7  ;;  %33 = vst [vmem:[#allocation5 + $0x8] sm:$0xff] %v30_v6 }
  0x8c   :  { %85 = shalt.err (!%p82_p12)
}
  0x8d   :  { %s86_s23 = scalar_lea.hbm %s138_s1, 256 }
  0x8e   :  { %p87_p13 = scmp.ne.s32.totalorder %s138_s1, %s86_s23  ;;  %p90_p0 = scmp.lt.u32.totalorder %s86_s23, %s138_s1 }
  0x90   :  { %p92_p1 = pnand %p90_p0, %p87_p13 }
  0x92   :  { %95 = shalt.err (!%p92_p1)
}
  0x93   :  { %43 = dma.vmem_to_hbm [thread:$0]  %s41_s20, 256, %s138_s1, [#allocation4]  }
  0x94   :  { %98 = dma.done.wait [#allocation4], 256  }
  0x95   :  { %99 = vsyncadd [#allocation4], 4294967040 }
  0x96   :  { %47 = vsyncpa [#allocation3], 1 }
  0x97   :  { %48 = vsyncpa [#allocation4], 1 }

</bundles_post_ra>
